<compile_context>
chip_gen: v6e
topology: v6e:2x2x1
jax: 0.10.0
libtpu: 0.0.40
codegen_flags: <defaults>
</compile_context>

<pallas_src>
import functools
import math

import jax
import jax.numpy as jnp
from jax import lax
from jax.experimental import pallas as pl
from jax.experimental.pallas import tpu as pltpu

_VMEM = pl.BlockSpec(memory_space=pltpu.MemorySpace.VMEM)


def _round_up(x, m):
    return ((x + m - 1) // m) * m


# ------------------------------ tiny-N fully fused kernel ------------------------------
def _fused_kernel(xq_ref, xs_ref, wq_ref, bq_ref, wkv_ref, bkv_ref, mask_ref, p_ref,
                  o_ref, *, num_heads, head_dim, n_actual, needs_mask):
    hm = num_heads * head_dim
    n_f = jnp.float32(n_actual)
    nh_f = jnp.float32(n_actual * num_heads)

    # MXU matmuls in native operand dtype, f32 accumulation.
    q = jnp.dot(xq_ref[...], wq_ref[...],
                preferred_element_type=jnp.float32) + bq_ref[...].astype(jnp.float32)
    kv = jnp.dot(xs_ref[...], wkv_ref[...],
                 preferred_element_type=jnp.float32) + bkv_ref[...].astype(jnp.float32)

    if needs_mask:  # static flag: only emitted when N was padded up
        rows = q.shape[0]
        ridx = lax.broadcasted_iota(jnp.int32, (rows, 1), 0)
        valid = (ridx < n_actual).astype(jnp.float32)
        q_n = q * valid            # masked copy only feeds the global norms
        kv = kv * valid
    else:
        q_n = q
    k = kv[:, :hm]
    v = kv[:, hm:]

    # Global Frobenius norms factored into a single scalar scale.
    scale = lax.rsqrt(jnp.sum(q_n * q_n)) * lax.rsqrt(jnp.sum(k * k))

    # Dense gram with precomputed block-diagonal head mask (scale folded in).
    gram = lax.dot_general(k, v, (((0,), (0,)), ((), ())),
                           preferred_element_type=jnp.float32) * (mask_ref[...] * scale)
    ksum = jnp.sum(k, axis=0, keepdims=True) * (scale * num_heads)  # 1/H folded here

    num = jnp.dot(q, gram, preferred_element_type=jnp.float32) + n_f * v      # [T, HM]
    denom = jnp.dot(q * ksum, mask_ref[...],
                    preferred_element_type=jnp.float32) + nh_f                # [T, HM]
    recip = pl.reciprocal(denom, approx=True)  # EUP slot; ~1e-3 rel err
    # head-mean via precomputed [HM, out_pad] selector -> lane-dense store
    o_ref[...] = jnp.dot(num * recip, p_ref[...],
                         preferred_element_type=jnp.float32).astype(o_ref.dtype)


# ------------------------------ pass 1: global reduction stats ------------------------------
def _stats_kernel(xq_ref, xs_ref, wq_ref, bq_ref, wkv_ref, bkv_ref, mask_ref,
                  gram_ref, ksum_ref, qsq_ref, ksq_ref,
                  *, num_heads, head_dim, n_actual, needs_mask):
    hm = num_heads * head_dim
    step = pl.program_id(0)

    @pl.when(step == 0)
    def _init():
        gram_ref[...] = jnp.zeros_like(gram_ref)
        ksum_ref[...] = jnp.zeros_like(ksum_ref)
        qsq_ref[...] = jnp.zeros_like(qsq_ref)
        ksq_ref[...] = jnp.zeros_like(ksq_ref)

    q = jnp.dot(xq_ref[...], wq_ref[...],
                preferred_element_type=jnp.float32) + bq_ref[...].astype(jnp.float32)
    kv = jnp.dot(xs_ref[...], wkv_ref[...],
                 preferred_element_type=jnp.float32) + bkv_ref[...].astype(jnp.float32)

    if needs_mask:
        rows = q.shape[0]
        ridx = step * rows + lax.broadcasted_iota(jnp.int32, (rows, 1), 0)
        valid = (ridx < n_actual).astype(jnp.float32)
        q = q * valid
        kv = kv * valid

    k = kv[:, :hm]
    v = kv[:, hm:]

    gram_ref[...] += lax.dot_general(k, v, (((0,), (0,)), ((), ())),
                                     preferred_element_type=jnp.float32)
    ksum_ref[...] += jnp.sum(k, axis=0, keepdims=True)
    qsq_ref[...] += jnp.sum(q * q, axis=0, keepdims=True)
    ksq_ref[...] += jnp.sum(k * k, axis=0, keepdims=True)

    @pl.when(step == pl.num_programs(0) - 1)
    def _finalize():
        # Fold 1/(||q||_F * ||k||_F) and the head mask into gram, and the same
        # scale (times H for the later head-mean fold) into ksum, so pass 2
        # needs no extra scalar state.
        scale = lax.rsqrt(jnp.sum(qsq_ref[...])) * lax.rsqrt(jnp.sum(ksq_ref[...]))
        gram_ref[...] = gram_ref[...] * (mask_ref[...] * scale)
        ksum_ref[...] = ksum_ref[...] * (scale * num_heads)


# ------------------------------ pass 2: per-tile output ------------------------------
def _output_kernel(xq_ref, xs_ref, wq_ref, bq_ref, wv_ref, bv_ref,
                   gram_ref, ksum_ref, mask_ref, p_ref, o_ref,
                   *, num_heads, n_actual):
    # n_actual is the GLOBAL token count (not the tile size): it feeds the
    # "+ N*vs" and "+ N" terms of the reference.
    n_f = jnp.float32(n_actual)
    nh_f = jnp.float32(n_actual * num_heads)

    q = jnp.dot(xq_ref[...], wq_ref[...],
                preferred_element_type=jnp.float32) + bq_ref[...].astype(jnp.float32)
    v = jnp.dot(xs_ref[...], wv_ref[...],
                preferred_element_type=jnp.float32) + bv_ref[...].astype(jnp.float32)

    num = jnp.dot(q, gram_ref[...], preferred_element_type=jnp.float32) + n_f * v
    z = q * ksum_ref[...]
    denom = jnp.dot(z, mask_ref[...], preferred_element_type=jnp.float32) + nh_f
    recip = pl.reciprocal(denom, approx=True)
    o_ref[...] = jnp.dot(num * recip, p_ref[...],
                         preferred_element_type=jnp.float32).astype(o_ref.dtype)


# ------------------------------ parameter prep (done once) ------------------------------
def prepare_params(params, *, num_heads, out_channels, in_channels, use_weight=True):
    """torch nn.Linear layout -> kernel layout, done once (not per forward)."""
    h, m = num_heads, out_channels
    hm = h * m
    wq = params["Wq_w"].T                              # [C_in, HM]
    bq = params["Wq_b"].reshape(1, hm)
    if use_weight:
        wk_t, wv_t = params["Wk_w"].T, params["Wv_w"].T
        bk, bv = params["Wk_b"], params["Wv_b"]
    else:
        assert h == 1 and in_channels == out_channels, \
            "use_weight=False requires num_heads == 1 and in_channels == out_channels"
        wk_t = params["Wk_w"].T
        wv_t = jnp.eye(in_channels, dtype=wk_t.dtype)
        bk = params["Wk_b"]
        bv = jnp.zeros((hm,), dtype=wk_t.dtype)
    wkv = jnp.concatenate([wk_t, wv_t], axis=1)        # [C_in, 2*HM]
    bkv = jnp.concatenate([bk, bv]).reshape(1, 2 * hm)

    # Block-diagonal head mask [HM, HM]; also acts as the per-head row-sum
    # operator for the attention normalizer.
    head = jnp.arange(hm) // m
    mask = (head[:, None] == head[None, :]).astype(jnp.float32)

    # Head-mean selector P[h*M+d, d] = 1, padded to >=128 lanes for a lane-dense
    # (unmasked vst) output store; wrapper slices back to out_channels.
    out_pad = m if m >= 128 else 128
    p = jnp.zeros((hm, out_pad), jnp.float32)
    p = p.at[jnp.arange(hm), jnp.arange(hm) % m].set(1.0)

    return {"wq": wq, "bq": bq, "wkv": wkv, "bkv": bkv,
            "wv": wv_t, "bv": bv.reshape(1, hm), "mask": mask, "p": p}


# ------------------------------ TransConvLayer.forward ------------------------------
def trans_conv_layer(prepped, query_input, source_input, *, num_heads, out_channels,
                     max_tile_n=512):
    """query_input, source_input: [N, C_in] -> [N, out_channels] (head-mean output)."""
    n, c_in = query_input.shape
    # The torch module's `+ N * vs` / `+ N` terms assume equal query/source counts.
    assert source_input.shape == (n, c_in), "query/source shapes must match"
    assert max_tile_n % 8 == 0
    h, m = num_heads, out_channels
    hm = h * m
    out_pad = prepped["p"].shape[1]
    dt = query_input.dtype
    itemsize = jnp.dtype(dt).itemsize

    tile_n = _round_up(n, 8) if n <= max_tile_n else max_tile_n
    n_pad = _round_up(n, tile_n)
    needs_mask = n_pad != n
    xq, xs = query_input, source_input
    if needs_mask:
        xq = jnp.pad(xq, ((0, n_pad - n), (0, 0)))
        xs = jnp.pad(xs, ((0, n_pad - n), (0, 0)))
    n_tiles = n_pad // tile_n

    wq, bq = prepped["wq"], prepped["bq"]
    wkv, bkv = prepped["wkv"], prepped["bkv"]
    wv, bv = prepped["wv"], prepped["bv"]
    mask, p = prepped["mask"], prepped["p"]

    # 32 MiB scoped VMEM: ample for <=512-row tiles, safe on v5e/v6e/v7x (64 MiB phys).
    vmem_limit = 32 * 1024 * 1024

    if n_tiles == 1:
        # Launch/latency-bound tiny-N path: everything in one fused call.
        kernel = functools.partial(_fused_kernel, num_heads=h, head_dim=m,
                                   n_actual=n, needs_mask=needs_mask)
        out = pl.pallas_call(
            kernel,
            in_specs=[_VMEM] * 8,
            out_specs=_VMEM,
            out_shape=jax.ShapeDtypeStruct((n_pad, out_pad), dt),
            compiler_params=pltpu.CompilerParams(vmem_limit_bytes=vmem_limit),
            cost_estimate=pl.CostEstimate(
                flops=2 * n_pad * (c_in * 3 * hm + 3 * hm * hm + hm * out_pad),
                transcendentals=n_pad * hm + 2,
                bytes_accessed=itemsize * (2 * n_pad * c_in + c_in * 3 * hm)
                + 4 * (n_pad * out_pad + 2 * hm * hm + hm * out_pad)),
        )(xq, xs, wq, bq, wkv, bkv, mask, p)
        return out[:n, :m]

    grid = (n_tiles,)
    stream = lambda i: (i, 0)     # per-tile rows of xq/xs/out
    resident = lambda i: (0, 0)   # weights / stats DMA'd once, stay resident

    # ---- pass 1: reduce over all N tiles (norms, K^T V gram, k_sum) ----------
    stats_kernel = functools.partial(_stats_kernel, num_heads=h, head_dim=m,
                                     n_actual=n, needs_mask=needs_mask)
    gram, ksum = pl.pallas_call(
        stats_kernel,
        grid_spec=pltpu.PrefetchScalarGridSpec(
            num_scalar_prefetch=0, grid=grid,
            in_specs=[pl.BlockSpec((tile_n, c_in), stream),
                      pl.BlockSpec((tile_n, c_in), stream),
                      pl.BlockSpec((c_in, hm), resident),
                      pl.BlockSpec((1, hm), resident),
                      pl.BlockSpec((c_in, 2 * hm), resident),
                      pl.BlockSpec((1, 2 * hm), resident),
                      pl.BlockSpec((hm, hm), resident)],
            out_specs=(pl.BlockSpec((hm, hm), resident),
                       pl.BlockSpec((1, hm), resident)),
            scratch_shapes=[pltpu.VMEM((1, hm), jnp.float32),
                            pltpu.VMEM((1, hm), jnp.float32)]),
        out_shape=(jax.ShapeDtypeStruct((hm, hm), jnp.float32),
                   jax.ShapeDtypeStruct((1, hm), jnp.float32)),
        compiler_params=pltpu.CompilerParams(
            dimension_semantics=("arbitrary",), vmem_limit_bytes=vmem_limit),
        cost_estimate=pl.CostEstimate(
            flops=2 * n_pad * (c_in * 3 * hm + hm * hm),
            transcendentals=2,
            bytes_accessed=itemsize * (2 * n_pad * c_in + c_in * 3 * hm)
            + 4 * (2 * hm * hm + hm)),
    )(xq, xs, wq, bq, wkv, bkv, mask)

    # ---- pass 2: stream query tiles, recompute q/v, apply prescaled stats ----
    out_kernel = functools.partial(_output_kernel, num_heads=h, n_actual=n)
    out = pl.pallas_call(
        out_kernel,
        grid_spec=pltpu.PrefetchScalarGridSpec(
            num_scalar_prefetch=0, grid=grid,
            in_specs=[pl.BlockSpec((tile_n, c_in), stream),
                      pl.BlockSpec((tile_n, c_in), stream),
                      pl.BlockSpec((c_in, hm), resident),
                      pl.BlockSpec((1, hm), resident),
                      pl.BlockSpec((c_in, hm), resident),
                      pl.BlockSpec((1, hm), resident),
                      pl.BlockSpec((hm, hm), resident),
                      pl.BlockSpec((1, hm), resident),
                      pl.BlockSpec((hm, hm), resident),
                      pl.BlockSpec((hm, out_pad), resident)],
            out_specs=pl.BlockSpec((tile_n, out_pad), stream)),
        out_shape=jax.ShapeDtypeStruct((n_pad, out_pad), dt),
        compiler_params=pltpu.CompilerParams(
            dimension_semantics=("parallel",), vmem_limit_bytes=vmem_limit),
        cost_estimate=pl.CostEstimate(
            flops=2 * n_pad * (c_in * 2 * hm + 2 * hm * hm + hm * out_pad),
            transcendentals=n_pad * hm,
            bytes_accessed=itemsize * (2 * n_pad * c_in + n_pad * out_pad)
            + 4 * (2 * hm * hm + c_in * 2 * hm + hm * out_pad)),
    )(xq, xs, wq, bq, wv, bv, gram, ksum, mask, p)
    return out[:n, :m]


# ------------------------------ pure-JAX reference ------------------------------
def _reference(params, query_input, source_input, *, num_heads, out_channels):
    q = (query_input @ params["Wq_w"].T + params["Wq_b"]).reshape(-1, num_heads, out_channels)
    k = (source_input @ params["Wk_w"].T + params["Wk_b"]).reshape(-1, num_heads, out_channels)
    v = (source_input @ params["Wv_w"].T + params["Wv_b"]).reshape(-1, num_heads, out_channels)
    qs = q / jnp.linalg.norm(q)
    ks = k / jnp.linalg.norm(k)
    n = qs.shape[0]
    kvs = jnp.einsum('lhm,lhd->hmd', ks, v)
    attention_num = jnp.einsum('nhm,hmd->nhd', qs, kvs) + n * v
    ks_sum = jnp.einsum('lhm->hm', ks)
    attention_normalizer = jnp.einsum('nhm,hm->nh', qs, ks_sum)[..., None] + n
    attn_output = attention_num / attention_normalizer
    return attn_output.mean(axis=1)


# ------------------------------ main ------------------------------
if __name__ == "__main__":
    in_channels = 32
    out_channels = 32
    num_heads = 2
    hm = out_channels * num_heads

    key = jax.random.PRNGKey(0)
    k1, k2, k3, k4, k5, k6, kq1, ks1, kq2, ks2 = jax.random.split(key, 10)

    bound = 1.0 / math.sqrt(in_channels)
    params = {
        "Wq_w": jax.random.uniform(k1, (hm, in_channels), jnp.float32, -bound, bound),
        "Wq_b": jax.random.uniform(k2, (hm,), jnp.float32, -bound, bound),
        "Wk_w": jax.random.uniform(k3, (hm, in_channels), jnp.float32, -bound, bound),
        "Wk_b": jax.random.uniform(k4, (hm,), jnp.float32, -bound, bound),
        "Wv_w": jax.random.uniform(k5, (hm, in_channels), jnp.float32, -bound, bound),
        "Wv_b": jax.random.uniform(k6, (hm,), jnp.float32, -bound, bound),
    }
    prepped = prepare_params(params, num_heads=num_heads, out_channels=out_channels,
                             in_channels=in_channels, use_weight=True)

    # ---- case 1: tiny N -> single fused launch --------------------------------
    N1 = 64
    q_in1 = jax.random.normal(kq1, (N1, in_channels), jnp.float32)
    s_in1 = jax.random.normal(ks1, (N1, in_channels), jnp.float32)
    out1 = jax.block_until_ready(
        trans_conv_layer(prepped, q_in1, s_in1,
                         num_heads=num_heads, out_channels=out_channels))
    ref1 = jax.block_until_ready(
        _reference(params, q_in1, s_in1, num_heads=num_heads, out_channels=out_channels))
    assert out1.shape == (N1, out_channels), out1.shape
    assert jnp.allclose(out1, ref1, rtol=1e-2, atol=1e-2), \
        float(jnp.max(jnp.abs(out1 - ref1)))

    # ---- case 2: larger N -> two-pass N-tiled grid (with row padding/masking) -
    N2 = 200
    q_in2 = jax.random.normal(kq2, (N2, in_channels), jnp.float32)
    s_in2 = jax.random.normal(ks2, (N2, in_channels), jnp.float32)
    out2 = jax.block_until_ready(
        trans_conv_layer(prepped, q_in2, s_in2,
                         num_heads=num_heads, out_channels=out_channels,
                         max_tile_n=128))  # force multi-tile path at small demo size
    ref2 = jax.block_until_ready(
        _reference(params, q_in2, s_in2, num_heads=num_heads, out_channels=out_channels))
    assert out2.shape == (N2, out_channels), out2.shape
    assert jnp.allclose(out2, ref2, rtol=1e-2, atol=1e-2), \
        float(jnp.max(jnp.abs(out2 - ref2)))

    print("KERNEL_OK")
</pallas_src>

<mosaic_0001>
module attributes {stable_mosaic.version = 11 : i64} {
  func.func @_fused_kernel(%arg0: memref<64x32xf32, #tpu.memory_space<vmem>>, %arg1: memref<64x32xf32, #tpu.memory_space<vmem>>, %arg2: memref<32x64xf32, #tpu.memory_space<vmem>>, %arg3: memref<1x64xf32, #tpu.memory_space<vmem>>, %arg4: memref<32x128xf32, #tpu.memory_space<vmem>>, %arg5: memref<1x128xf32, #tpu.memory_space<vmem>>, %arg6: memref<64x64xf32, #tpu.memory_space<vmem>>, %arg7: memref<64x128xf32, #tpu.memory_space<vmem>>, %arg8: memref<64x128xf32, #tpu.memory_space<vmem>>) attributes {dimension_semantics = [], scalar_prefetch = 0 : i64, scratch_operands = 0 : i64, tpu.core_type = #tpu.core_type<tc>} {
    %c0 = arith.constant 0 : index
    %c0_0 = arith.constant 0 : index
    %0 = vector.load %arg0[%c0, %c0_0] : memref<64x32xf32, #tpu.memory_space<vmem>>, vector<64x32xf32>
    %c0_1 = arith.constant 0 : index
    %c0_2 = arith.constant 0 : index
    %1 = vector.load %arg2[%c0_1, %c0_2] : memref<32x64xf32, #tpu.memory_space<vmem>>, vector<32x64xf32>
    %cst = arith.constant dense<0.000000e+00> : vector<64x64xf32>
    %2 = tpu.matmul %0, %1, %cst {dimension_numbers = #tpu.dot_dimension_numbers<[1], [0], [0], [1], [0, 0, 1, 1], [], []>} : vector<64x32xf32>, vector<32x64xf32>, vector<64x64xf32> -> vector<64x64xf32>
    %c0_3 = arith.constant 0 : index
    %c0_4 = arith.constant 0 : index
    %3 = vector.load %arg3[%c0_3, %c0_4] : memref<1x64xf32, #tpu.memory_space<vmem>>, vector<1x64xf32>
    %4 = vector.broadcast %3 : vector<1x64xf32> to vector<64x64xf32>
    %5 = arith.addf %2, %4 : vector<64x64xf32>
    %c0_5 = arith.constant 0 : index
    %c0_6 = arith.constant 0 : index
    %6 = vector.load %arg1[%c0_5, %c0_6] : memref<64x32xf32, #tpu.memory_space<vmem>>, vector<64x32xf32>
    %c0_7 = arith.constant 0 : index
    %c0_8 = arith.constant 0 : index
    %7 = vector.load %arg4[%c0_7, %c0_8] : memref<32x128xf32, #tpu.memory_space<vmem>>, vector<32x128xf32>
    %cst_9 = arith.constant dense<0.000000e+00> : vector<64x128xf32>
    %8 = tpu.matmul %6, %7, %cst_9 {dimension_numbers = #tpu.dot_dimension_numbers<[1], [0], [0], [1], [0, 0, 1, 1], [], []>} : vector<64x32xf32>, vector<32x128xf32>, vector<64x128xf32> -> vector<64x128xf32>
    %c0_10 = arith.constant 0 : index
    %c0_11 = arith.constant 0 : index
    %9 = vector.load %arg5[%c0_10, %c0_11] : memref<1x128xf32, #tpu.memory_space<vmem>>, vector<1x128xf32>
    %10 = vector.broadcast %9 : vector<1x128xf32> to vector<64x128xf32>
    %11 = arith.addf %8, %10 : vector<64x128xf32>
    %12 = vector.extract_strided_slice %11 {offsets = [0, 0], sizes = [64, 64], strides = [1, 1]} : vector<64x128xf32> to vector<64x64xf32>
    %13 = vector.extract_strided_slice %11 {offsets = [0, 64], sizes = [64, 64], strides = [1, 1]} : vector<64x128xf32> to vector<64x64xf32>
    %14 = arith.mulf %5, %5 : vector<64x64xf32>
    %15 = vector.shape_cast %14 : vector<64x64xf32> to vector<1x64x64xf32>
    %cst_12 = arith.constant dense<0.000000e+00> : vector<1xf32>
    %16 = vector.multi_reduction <add>, %15, %cst_12 [1, 2] : vector<1x64x64xf32> to vector<1xf32>
    %17 = vector.shape_cast %16 : vector<1xf32> to vector<1x1x1xf32>
    %18 = vector.extract %17[0, 0, 0] : f32 from vector<1x1x1xf32>
    %19 = math.rsqrt %18 : f32
    %20 = arith.mulf %12, %12 : vector<64x64xf32>
    %21 = vector.shape_cast %20 : vector<64x64xf32> to vector<1x64x64xf32>
    %cst_13 = arith.constant dense<0.000000e+00> : vector<1xf32>
    %22 = vector.multi_reduction <add>, %21, %cst_13 [1, 2] : vector<1x64x64xf32> to vector<1xf32>
    %23 = vector.shape_cast %22 : vector<1xf32> to vector<1x1x1xf32>
    %24 = vector.extract %23[0, 0, 0] : f32 from vector<1x1x1xf32>
    %25 = math.rsqrt %24 : f32
    %26 = arith.mulf %19, %25 : f32
    %cst_14 = arith.constant dense<0.000000e+00> : vector<64x64xf32>
    %27 = tpu.matmul %12, %13, %cst_14 {dimension_numbers = #tpu.dot_dimension_numbers<[0], [0], [1], [1], [0, 1, 1, 1], [], []>} : vector<64x64xf32>, vector<64x64xf32>, vector<64x64xf32> -> vector<64x64xf32>
    %c0_15 = arith.constant 0 : index
    %c0_16 = arith.constant 0 : index
    %28 = vector.load %arg6[%c0_15, %c0_16] : memref<64x64xf32, #tpu.memory_space<vmem>>, vector<64x64xf32>
    %29 = vector.broadcast %26 : f32 to vector<64x64xf32>
    %30 = arith.mulf %28, %29 : vector<64x64xf32>
    %31 = arith.mulf %27, %30 : vector<64x64xf32>
    %cst_17 = arith.constant dense<0.000000e+00> : vector<64xf32>
    %32 = vector.multi_reduction <add>, %12, %cst_17 [0] : vector<64x64xf32> to vector<64xf32>
    %33 = vector.shape_cast %32 : vector<64xf32> to vector<1x64xf32>
    %cst_18 = arith.constant 2.000000e+00 : f32
    %34 = arith.mulf %26, %cst_18 : f32
    %35 = vector.broadcast %34 : f32 to vector<1x64xf32>
    %36 = arith.mulf %33, %35 : vector<1x64xf32>
    %cst_19 = arith.constant dense<0.000000e+00> : vector<64x64xf32>
    %37 = tpu.matmul %5, %31, %cst_19 {dimension_numbers = #tpu.dot_dimension_numbers<[1], [0], [0], [1], [0, 0, 1, 1], [], []>} : vector<64x64xf32>, vector<64x64xf32>, vector<64x64xf32> -> vector<64x64xf32>
    %cst_20 = arith.constant 6.400000e+01 : f32
    %38 = vector.broadcast %cst_20 : f32 to vector<64x64xf32>
    %39 = arith.mulf %38, %13 : vector<64x64xf32>
    %40 = arith.addf %37, %39 : vector<64x64xf32>
    %41 = vector.broadcast %36 : vector<1x64xf32> to vector<64x64xf32>
    %42 = arith.mulf %5, %41 : vector<64x64xf32>
    %c0_21 = arith.constant 0 : index
    %c0_22 = arith.constant 0 : index
    %43 = vector.load %arg6[%c0_21, %c0_22] : memref<64x64xf32, #tpu.memory_space<vmem>>, vector<64x64xf32>
    %cst_23 = arith.constant dense<0.000000e+00> : vector<64x64xf32>
    %44 = tpu.matmul %42, %43, %cst_23 {dimension_numbers = #tpu.dot_dimension_numbers<[1], [0], [0], [1], [0, 0, 1, 1], [], []>} : vector<64x64xf32>, vector<64x64xf32>, vector<64x64xf32> -> vector<64x64xf32>
    %cst_24 = arith.constant 1.280000e+02 : f32
    %45 = vector.broadcast %cst_24 : f32 to vector<64x64xf32>
    %46 = arith.addf %44, %45 : vector<64x64xf32>
    %47 = tpu.reciprocal %46 {approx = true} : vector<64x64xf32> -> vector<64x64xf32>
    %48 = arith.mulf %40, %47 : vector<64x64xf32>
    %c0_25 = arith.constant 0 : index
    %c0_26 = arith.constant 0 : index
    %49 = vector.load %arg7[%c0_25, %c0_26] : memref<64x128xf32, #tpu.memory_space<vmem>>, vector<64x128xf32>
    %cst_27 = arith.constant dense<0.000000e+00> : vector<64x128xf32>
    %50 = tpu.matmul %48, %49, %cst_27 {dimension_numbers = #tpu.dot_dimension_numbers<[1], [0], [0], [1], [0, 0, 1, 1], [], []>} : vector<64x64xf32>, vector<64x128xf32>, vector<64x128xf32> -> vector<64x128xf32>
    %c0_28 = arith.constant 0 : index
    %c0_29 = arith.constant 0 : index
    %51 = vector.load %arg8[%c0_28, %c0_29] : memref<64x128xf32, #tpu.memory_space<vmem>>, vector<64x128xf32>
    tpu.vector_store %arg8[%c0_28, %c0_29], %50 {strides = array<i32>} : memref<64x128xf32, #tpu.memory_space<vmem>>, vector<64x128xf32>,
    return
  }
}

</mosaic_0001>

<bundles_post_ra>
// kernel: tpu_custom_call.1
= control target key start
LH: loop header
LB: loop body
LE: loop exit
PB: predicated region body
PF: predicated region fallthrough
CT: control target
= control target key end

     0   :  { %vm49_vm0 = vcmask 261120   ;;  %s1897_s0 = inlined_call_operand.vmem [shape: f32[64,32], index: 0, kind: input, shape index: {}]   ;;  %s1898_s1 = inlined_call_operand.vmem [shape: f32[64,32], index: 1, kind: input, shape index: {}]   ;;  %s1899_s2 = inlined_call_operand.vmem [shape: f32[32,64], index: 2, kind: input, shape index: {}]   ;;  %s1900_s3 = inlined_call_operand.vmem [shape: f32[1,64], index: 3, kind: input, shape index: {}]   ;;  %s1901_s4 = inlined_call_operand.vmem [shape: f32[32,128], index: 4, kind: input, shape index: {}]   ;;  %s1902_s5 = inlined_call_operand.vmem [shape: f32[1,128], index: 5, kind: input, shape index: {}]   ;;  %s1903_s6 = inlined_call_operand.vmem [shape: f32[64,64], index: 6, kind: input, shape index: {}]   ;;  %s1904_s7 = inlined_call_operand.vmem [shape: f32[64,128], index: 7, kind: input, shape index: {}]   ;;  %s1905_s8 = inlined_call_operand.hbm [shape: f32[64,128], index: 8, kind: output, shape index: {}]  }
   0x1   :  { %v190_v0 = vld [vmem:[%s1901_s4 + $0x18] sm:$0xff]  ;;  %v189_v1 = vld [vmem:[%s1901_s4 + $0x10] sm:$0xff]  ;;  %v179_v2 = vld [vmem:[%s1898_s1] sm:$0xff] }
   0x2   :  { %1282 = vmatprep.subr.mxu1 %v190_v0  ;;  %v188_v3 = vld [vmem:[%s1901_s4 + $0x8] sm:$0xff]  ;;  %1290 = vmatprep.mubr.msk.f32.mxu1 %vm49_vm0, %v179_v2  ;;  %v187_v4 = vld [vmem:[%s1901_s4] sm:$0xff]  ;;  %v41_v5 = vld [vmem:[%s1899_s2 + $0x18] sm:$0xff] }
   0x3   :  { %1283 = vmatpush3.msra.mxu1 %v190_v0  ;;  %v40_v6 = vld [vmem:[%s1899_s2 + $0x10] sm:$0xff]  ;;  %1262 = vmatprep.subr.mxu0 %v41_v5  ;;  %v180_v7 = vld [vmem:[%s1898_s1 + $0x8] sm:$0xff]  ;;  %v38_v10 = vld [vmem:[%s1899_s2] sm:$0xff] }
   0x4   :  { %1284 = vmatprep.subr.mxu1 %v189_v1  ;;  %1263 = vmatpush3.msra.mxu0 %v41_v5  ;;  %v39_v8 = vld [vmem:[%s1899_s2 + $0x8] sm:$0xff]  ;;  %v181_v9 = vld [vmem:[%s1898_s1 + $0x10] sm:$0xff]  ;;  %v30_v11 = vld [vmem:[%s1897_s0] sm:$0xff] }
   0x5   :  { %1285 = vmatpush3.msra.mxu1 %v189_v1  ;;  %1264 = vmatprep.subr.mxu0 %v40_v6 }
   0x6   :  { %1286 = vmatprep.subr.mxu1 %v188_v3  ;;  %1265 = vmatpush3.msra.mxu0 %v40_v6 }
   0x7   :  { %1287 = vmatpush3.msra.mxu1 %v188_v3 }
   0x8   :  { %1288 = vmatprep.subr.mxu1 %v187_v4 }
   0x9   :  { %1289 = vmatpush3.msra.mxu1 %v187_v4 }
   0xa   :  { %13 = vsyncpa [#allocation3], 0  ;;  %1291 = vmatmul.mubr.msk.f32.vlgmr.msra.gmra.mxu1 %vm49_vm0, %v180_v7  ;;  %1266 = vmatprep.subr.mxu0 %v39_v8  ;;  %v182_v12 = vld [vmem:[%s1898_s1 + $0x18] sm:$0xff]  ;;  %v31_v13 = vld [vmem:[%s1897_s0 + $0x8] sm:$0xff]  ;;  %vm335_vm1 = vcmask 523264  }
   0xb   :  { %1293 = vmatprep.mubr.msk.f32.mxu1 %vm49_vm0, %v181_v9  ;;  %1267 = vmatpush3.msra.mxu0 %v39_v8  ;;  %v183_v14 = vld [vmem:[%s1898_s1 + $0x20] sm:$0xff]  ;;  %v32_v15 = vld [vmem:[%s1897_s0 + $0x10] sm:$0xff]  ;;  %v184_v16 = vld [vmem:[%s1898_s1 + $0x28] sm:$0xff] }
   0xc   :  { %1268 = vmatprep.subr.mxu0 %v38_v10  ;;  %1270 = vmatprep.mubr.msk.f32.mxu0 %vm49_vm0, %v30_v11  ;;  %v33_v17 = vld [vmem:[%s1897_s0 + $0x18] sm:$0xff]  ;;  %v185_v18 = vld [vmem:[%s1898_s1 + $0x30] sm:$0xff]  ;;  %v34_v19 = vld [vmem:[%s1897_s0 + $0x20] sm:$0xff] }
   0xd   :  { %1269 = vmatpush3.msra.mxu0 %v38_v10  ;;  %v186_v20 = vld [vmem:[%s1898_s1 + $0x38] sm:$0xff]  ;;  %v35_v21 = vld [vmem:[%s1897_s0 + $0x28] sm:$0xff]  ;;  %v36_v22 = vld [vmem:[%s1897_s0 + $0x30] sm:$0xff] }
   0xe   :  { %1294 = vmatmul.mubr.msk.f32.gmra.mxu1 %vm49_vm0, %v182_v12  ;;  %1271 = vmatmul.mubr.msk.f32.vlgmr.msra.gmra.mxu0 %vm49_vm0, %v31_v13  ;;  %v37_v23 = vld [vmem:[%s1897_s0 + $0x38] sm:$0xff]  ;;  %v1133_v26 = vld [vmem:[%s1902_s5] ss:$0 sm:$0xff]  ;;  %s1469_s0 = smov 64  }
   0xf   :  { %1296 = vmatprep.mubr.msk.f32.mxu1 %vm49_vm0, %v183_v14  ;;  %1273 = vmatprep.mubr.msk.f32.mxu0 %vm49_vm0, %v32_v15  ;;  %v1612_v29 = vld [vmem:[%s1900_s3] ss:$0 sm:$0xff] }
  0x12   :  { %1297 = vmatmul.mubr.msk.f32.gmra.mxu1 %vm49_vm0, %v184_v16  ;;  %1274 = vmatmul.mubr.msk.f32.gmra.mxu0 %vm49_vm0, %v33_v17 }
  0x13   :  { %1299 = vmatprep.mubr.msk.f32.mxu1 %vm49_vm0, %v185_v18  ;;  %1276 = vmatprep.mubr.msk.f32.mxu0 %vm49_vm0, %v34_v19 }
  0x16   :  { %1300 = vmatmul.mubr.msk.f32.gmra.mxu1 %vm49_vm0, %v186_v20  ;;  %1277 = vmatmul.mubr.msk.f32.gmra.mxu0 %vm49_vm0, %v35_v21 }
  0x17   :  { %1279 = vmatprep.mubr.msk.f32.mxu0 %vm49_vm0, %v36_v22 }
  0x1a   :  { %1280 = vmatmul.mubr.msk.f32.gmra.mxu0 %vm49_vm0, %v37_v23 }
  0xca   :  { %v1292_v24 = vpop.f32.mrf.mxu1 }
  0xcb   :  { %v1651_v50 = vadd.f32 %v1292_v24, %v1133_v26 }
  0xcc   :  { %v288_v25 = vpop.f32.mrf.mxu1 }
  0xcd   :  { %v1653_v51 = vadd.f32 %v1133_v26, %v288_v25  ;;  %v364_v63 = vmul.f32 %v1651_v50, %v1651_v50 }
  0xce   :  { %v1295_v27 = vpop.f32.mrf.mxu1  ;;  %v1272_v28 = vpop.f32.mrf.mxu0 }
  0xcf   :  { %v1614_v30 = vadd.f32 %v1295_v27, %v1133_v26  ;;  %v1630_v39 = vadd.f32 %v1272_v28, %v1612_v29  ;;  %v363_v58 = vmul.f32 %v1653_v51, %v1653_v51  ;;  %v372_v7 = vsel %vm335_vm1, %v364_v63, 0.0 }
  0xd0   :  { %v298_v31 = vpop.f32.mrf.mxu1  ;;  %v140_v32 = vpop.f32.mrf.mxu0 }
  0xd1   :  { %v1616_v33 = vadd.f32 %v1133_v26, %v298_v31  ;;  %445 = vrot.lane.b32.xlu0 %v1614_v30, %s1469_s0  ;;  %v1621_v34 = vadd.f32 %v1612_v29, %v140_v32  ;;  %v328_v45 = vmul.f32 %v1630_v39, %v1630_v39  ;;  %v371_v5 = vsel %vm335_vm1, %v363_v58, 0.0 }
  0xd2   :  { %v1298_v35 = vpop.f32.mrf.mxu1  ;;  %v1275_v36 = vpop.f32.mrf.mxu0  ;;  %v373_v10 = vadd.f32 %v372_v7, %v371_v5  ;;  %v366_v14 = vmul.f32 %v1614_v30, %v1614_v30 }
  0xd3   :  { %v1623_v37 = vadd.f32 %v1298_v35, %v1133_v26  ;;  %443 = vrot.lane.b32.xlu1 %v1616_v33, %s1469_s0  ;;  %1346 = vmatprep.mubr.msk.f32.mxu1 %vm335_vm1, %v1621_v34  ;;  %v327_v46 = vmul.f32 %v1621_v34, %v1621_v34  ;;  %v337_v52 = vsel %vm335_vm1, %v328_v45, 0.0  ;;  %v1660_v54 = vadd.f32 %v1275_v36, %v1612_v29 }
  0xd4   :  { %v308_v38 = vpop.f32.mrf.mxu1  ;;  %v150_v41 = vpop.f32.mrf.mxu0  ;;  %v365_v0 = vmul.f32 %v1616_v33, %v1616_v33  ;;  %v376_v21 = vsel %vm335_vm1, %v366_v14, 0.0 }
  0xd5   :  { %v1636_v44 = vadd.f32 %v1133_v26, %v308_v38  ;;  %v1645_v47 = vadd.f32 %v1612_v29, %v150_v41  ;;  %v336_v53 = vsel %vm335_vm1, %v327_v46, 0.0  ;;  %v330_v59 = vmul.f32 %v1660_v54, %v1660_v54 }
  0xd6   :  { %v1301_v40 = vpop.f32.mrf.mxu1  ;;  %v1278_v48 = vpop.f32.mrf.mxu0  ;;  %v338_v57 = vadd.f32 %v337_v52, %v336_v53  ;;  %v374_v8 = vsel %vm335_vm1, %v365_v0, 0.0  ;;  %v368_v27 = vmul.f32 %v1623_v37, %v1623_v37  ;;  %v642_v52 = vmul.f32 64.0, %v1651_v50 }
  0xd7   :  { %v1632_v42 = vadd.f32 %v1301_v40, %v1133_v26  ;;  %449 = vrot.lane.b32.xlu1 %v1623_v37, %s1469_s0  ;;  %v329_v55 = vmul.f32 %v1645_v47, %v1645_v47  ;;  %v341_v2 = vsel %vm335_vm1, %v330_v59, 0.0  ;;  %v1682_v3 = vadd.f32 %v1278_v48, %v1612_v29 }
  0xd8   :  { %v318_v43 = vpop.f32.mrf.mxu1  ;;  %v160_v56 = vpop.f32.mrf.mxu0  ;;  %v375_v15 = vadd.f32 %v374_v8, %v373_v10  ;;  %v367_v16 = vmul.f32 %v1636_v44, %v1636_v44  ;;  %v380_v35 = vsel %vm335_vm1, %v368_v27, 0.0  ;;  %v641_v48 = vmul.f32 64.0, %v1653_v51 }
  0xd9   :  { %453 = vrot.lane.b32.xlu0 %v1632_v42, %s1469_s0  ;;  %v1647_v49 = vadd.f32 %v1133_v26, %v318_v43  ;;  %v339_v60 = vsel %vm335_vm1, %v329_v55, 0.0  ;;  %v1672_v61 = vadd.f32 %v1612_v29, %v160_v56  ;;  %v332_v11 = vmul.f32 %v1682_v3, %v1682_v3 }
  0xda   :  { %v1281_v62 = vpop.f32.mrf.mxu0  ;;  %v340_v1 = vadd.f32 %v339_v60, %v338_v57  ;;  %v377_v22 = vadd.f32 %v376_v21, %v375_v15  ;;  %v378_v23 = vsel %vm335_vm1, %v367_v16, 0.0  ;;  %v370_v38 = vmul.f32 %v1632_v42, %v1632_v42  ;;  %v1763_v21 = vld [vmem:[%s1903_s6 + $0x28] sm:$0xff] }
  0xdb   :  { %447 = vrot.lane.b32.xlu1 %v1636_v44, %s1469_s0  ;;  %v331_v4 = vmul.f32 %v1672_v61, %v1672_v61  ;;  %v1700_v18 = vadd.f32 %v1281_v62, %v1612_v29  ;;  %v345_v20 = vsel %vm335_vm1, %v332_v11, 0.0  ;;  %v643_v53 = vmul.f32 64.0, %v1616_v33 }
  0xdc   :  { %v170_v6 = vpop.f32.mrf.mxu0  ;;  %v342_v9 = vadd.f32 %v341_v2, %v340_v1  ;;  %v379_v28 = vadd.f32 %v378_v23, %v377_v22  ;;  %v384_v45 = vsel %vm335_vm1, %v370_v38, 0.0  ;;  %v644_v55 = vmul.f32 64.0, %v1614_v30 }
  0xdd   :  { %451 = vrot.lane.b32.xlu0 %v1647_v49, %s1469_s0  ;;  %v343_v12 = vsel %vm335_vm1, %v331_v4, 0.0  ;;  %v1693_v13 = vadd.f32 %v1612_v29, %v170_v6  ;;  %v334_v25 = vmul.f32 %v1700_v18, %v1700_v18  ;;  %v369_v29 = vmul.f32 %v1647_v49, %v1647_v49 }
  0xde   :  { %v344_v17 = vadd.f32 %v343_v12, %v342_v9  ;;  %v381_v36 = vadd.f32 %v380_v35, %v379_v28  ;;  %v645_v56 = vmul.f32 64.0, %v1636_v44  ;;  %v646_v57 = vmul.f32 64.0, %v1623_v37  ;;  %v1776_v35 = vld [vmem:[%s1903_s6 + $0x20] sm:$0xff] }
  0xdf   :  { %441 = vrot.lane.b32.xlu1 %v1651_v50, %s1469_s0  ;;  %v333_v19 = vmul.f32 %v1693_v13, %v1693_v13  ;;  %v349_v32 = vsel %vm335_vm1, %v334_v25, 0.0  ;;  %v382_v40 = vsel %vm335_vm1, %v369_v29, 0.0  ;;  %v647_v58 = vmul.f32 64.0, %v1647_v49 }
  0xe0   :  { %v346_v24 = vadd.f32 %v345_v20, %v344_v17  ;;  %v383_v43 = vadd.f32 %v382_v40, %v381_v36  ;;  %v648_v59 = vmul.f32 64.0, %v1632_v42  ;;  %v1756_v20 = vld [vmem:[%s1903_s6 + $0x30] sm:$0xff]  ;;  %v1781_v36 = vld [vmem:[%s1903_s6 + $0x18] sm:$0xff] }
  0xe1   :  { %v347_v26 = vsel %vm335_vm1, %v333_v19, 0.0  ;;  %v1751_v19 = vld [vmem:[%s1903_s6 + $0x38] sm:$0xff]  ;;  %v1788_v40 = vld [vmem:[%s1903_s6 + $0x10] sm:$0xff] }
  0xe2   :  { %v348_v31 = vadd.f32 %v347_v26, %v346_v24  ;;  %v385_v46 = vadd.f32 %v384_v45, %v383_v43  ;;  %v1797_v45 = vld [vmem:[%s1903_s6 + $0x8] sm:$0xff] }
  0xe3   :  { %439 = vrot.lane.b32.xlu1 %v1653_v51, %s1469_s0 }
  0xe4   :  { %v350_v41 = vadd.f32 %v349_v32, %v348_v31 }
  0xfc   :  { %351 = vadd.xlane.f32.xlu0 %v350_v41 }
 0x100   :  { %386 = vadd.xlane.f32.xlu0 %v385_v46  ;;  %v1804_v46 = vld [vmem:[%s1903_s6] sm:$0xff] }
 0x10c   :  { %399 = vxpose.xlu1.b32.start [1/8] (short) (narrow) %v1653_v51, 64 }
 0x110   :  { %400 = vxpose.xlu1.b32.cont [2/8] (short) (narrow) %v1651_v50, 64 }
 0x114   :  { %401 = vxpose.xlu1.b32.cont [3/8] (short) (narrow) %v1616_v33, 64 }
 0x116   :  { %657 = vrot.lane.b32.xlu0 %v641_v48, %s1469_s0 }
 0x118   :  { %402 = vxpose.xlu1.b32.cont [4/8] (short) (narrow) %v1614_v30, 64 }
 0x11a   :  { %659 = vrot.lane.b32.xlu0 %v642_v52, %s1469_s0 }
 0x11c   :  { %403 = vxpose.xlu1.b32.cont [5/8] (short) (narrow) %v1636_v44, 64 }
 0x11e   :  { %661 = vrot.lane.b32.xlu0 %v643_v53, %s1469_s0  ;;  %v617_v53 = vsel %vm335_vm1, %v1653_v51, 0.0 }
 0x120   :  { %404 = vxpose.xlu1.b32.cont [6/8] (short) (narrow) %v1623_v37, 64 }
 0x122   :  { %663 = vrot.lane.b32.xlu0 %v644_v55, %s1469_s0  ;;  %v618_v55 = vsel %vm335_vm1, %v1651_v50, 0.0  ;;  %v628_v50 = vsel %vm335_vm1, %v1647_v49, 0.0 }
 0x124   :  { %405 = vxpose.xlu1.b32.cont [7/8] (short) (narrow) %v1647_v49, 64 }
 0x126   :  { %665 = vrot.lane.b32.xlu0 %v645_v56, %s1469_s0  ;;  %v620_v56 = vsel %vm335_vm1, %v1616_v33, 0.0  ;;  %v630_v33 = vsel %vm335_vm1, %v1632_v42, 0.0 }
 0x128   :  { %406 = vxpose.xlu1.b32.end [8/8] (short) (narrow) %v1632_v42, 64 }
 0x12a   :  { %667 = vrot.lane.b32.xlu0 %v646_v57, %s1469_s0  ;;  %v619_v57 = vadd.f32 %v618_v55, %v617_v53 }
 0x12e   :  { %669 = vrot.lane.b32.xlu0 %v647_v58, %s1469_s0  ;;  %v621_v58 = vadd.f32 %v620_v56, %v619_v57 }
 0x143   :  { %v446_v62 = vpop.permute.xlu0 %445 }
 0x145   :  { %v444_v60 = vpop.permute.xlu1 %443 }
 0x146   :  { %671 = vrot.lane.b32.xlu1 %v648_v59, %s1469_s0  ;;  %v622_v59 = vsel %vm335_vm1, %v1614_v30, 0.0 }
 0x149   :  { %v450_v63 = vpop.permute.xlu1 %449 }
 0x14b   :  { %v454_v0 = vpop.permute.xlu0 %453 }
 0x14c   :  { %1302 = vmatprep.subr.mxu0 %v454_v0 }
 0x14d   :  { %1303 = vmatpush3.msra.mxu0 %v454_v0  ;;  %v448_v1 = vpop.permute.xlu1 %447  ;;  %v626_v0 = vsel %vm335_vm1, %v1623_v37, 0.0 }
 0x14f   :  { %v452_v2 = vpop.permute.xlu0 %451 }
 0x150   :  { %1304 = vmatprep.subr.mxu0 %v452_v2 }
 0x151   :  { %1305 = vmatpush3.msra.mxu0 %v452_v2  ;;  %v442_v4 = vpop.permute.xlu1 %441 }
 0x152   :  { %1306 = vmatprep.subr.mxu0 %v450_v63 }
 0x153   :  { %1307 = vmatpush3.msra.mxu0 %v450_v63 }
 0x154   :  { %1308 = vmatprep.subr.mxu0 %v448_v1 }
 0x155   :  { %1309 = vmatpush3.msra.mxu0 %v448_v1  ;;  %v440_v5 = vpop.permute.xlu1 %439 }
 0x156   :  { %1310 = vmatprep.subr.mxu0 %v446_v62 }
 0x157   :  { %1311 = vmatpush3.msra.mxu0 %v446_v62  ;;  %v624_v62 = vsel %vm335_vm1, %v1636_v44, 0.0 }
 0x158   :  { %1312 = vmatprep.subr.mxu0 %v444_v60 }
 0x159   :  { %1313 = vmatpush3.msra.mxu0 %v444_v60  ;;  %v623_v60 = vadd.f32 %v622_v59, %v621_v58 }
 0x15a   :  { %1314 = vmatprep.subr.mxu0 %v442_v4 }
 0x15b   :  { %1315 = vmatpush3.msra.mxu0 %v442_v4  ;;  %v625_v63 = vadd.f32 %v624_v62, %v623_v60 }
 0x15c   :  { %1316 = vmatprep.subr.mxu0 %v440_v5 }
 0x15d   :  { %1317 = vmatpush3.msra.mxu0 %v440_v5  ;;  %v627_v51 = vadd.f32 %v626_v0, %v625_v63 }
 0x15e   :  { %1358 = vmatprep.subr.mxu0 %v1751_v19 }
 0x15f   :  { %v629_v1 = vadd.f32 %v628_v50, %v627_v51 }
 0x161   :  { %v631_v2 = vadd.f32 %v630_v33, %v629_v1 }
 0x163   :  { %v632_v4 = vrot.slane %v631_v2, 4 }
 0x165   :  { %v633_v5 = vadd.f32 %v632_v4, %v631_v2 }
 0x167   :  { %v634_v30 = vrot.slane %v633_v5, 2 }
 0x185   :  { %v352_v6 = vpop.xlane.xlu0 %351 }
 0x186   :  { %v353_v7 = vrot.slane %v352_v6, 4 }
 0x188   :  { %v354_v8 = vadd.f32 %v353_v7, %v352_v6  ;;  %v415_v9 = vpop.trf.xlu1  ;;  %v635_v6 = vadd.f32 %v634_v30, %v633_v5 }
 0x189   :  { %1318 = vmatprep.mubr.msk.f32.mxu0 %vm335_vm1, %v415_v9  ;;  %v387_v26 = vpop.xlane.xlu0 %386 }
 0x18a   :  { %v355_v10 = vrot.slane %v354_v8, 2  ;;  %v388_v27 = vrot.slane %v387_v26, 4  ;;  %v636_v7 = vrot.slane %v635_v6, 1 }
 0x18c   :  { %v416_v11 = vpop.trf.xlu1  ;;  %v356_v12 = vadd.f32 %v355_v10, %v354_v8  ;;  %v389_v28 = vadd.f32 %v388_v27, %v387_v26  ;;  %v637_v44 = vadd.f32 %v636_v7, %v635_v6 }
 0x18d   :  { %1319 = vmatmul.mubr.msk.f32.vlgmr.msra.gmra.mxu0 %vm335_vm1, %v416_v11  ;;  %v658_v57 = vpop.permute.xlu0 %657 }
 0x18e   :  { %v357_v14 = vrot.slane %v356_v12, 1  ;;  %1359 = vmatpush3.msra.mxu0 %v1751_v19  ;;  %v390_v31 = vrot.slane %v389_v28, 2 }
 0x18f   :  { %1360 = vmatprep.subr.mxu0 %v1756_v20 }
 0x190   :  { %v417_v15 = vpop.trf.xlu1  ;;  %v358_v16 = vadd.f32 %v357_v14, %v356_v12  ;;  %1361 = vmatpush3.msra.mxu0 %v1756_v20  ;;  %v391_v32 = vadd.f32 %v390_v31, %v389_v28 }
 0x191   :  { %1321 = vmatprep.mubr.msk.f32.mxu0 %vm335_vm1, %v417_v15  ;;  %1362 = vmatprep.subr.mxu0 %v1763_v21  ;;  %v660_v59 = vpop.permute.xlu0 %659 }
 0x192   :  { %1414 = vpush %v358_v16  ;;  %1363 = vmatpush3.msra.mxu0 %v1763_v21  ;;  %v392_v38 = vrot.slane %v391_v32, 1 }
 0x193   :  { %1364 = vmatprep.subr.mxu0 %v1776_v35 }
 0x194   :  { %v418_v17 = vpop.trf.xlu1  ;;  %1365 = vmatpush3.msra.mxu0 %v1776_v35  ;;  %v393_v43 = vadd.f32 %v392_v38, %v391_v32 }
 0x195   :  { %1322 = vmatmul.mubr.msk.f32.gmra.mxu0 %vm335_vm1, %v418_v17  ;;  %1366 = vmatprep.subr.mxu0 %v1781_v36  ;;  %v662_v51 = vpop.permute.xlu0 %661 }
 0x196   :  { %1367 = vmatpush3.msra.mxu0 %v1781_v36 }
 0x197   :  { %1368 = vmatprep.subr.mxu0 %v1788_v40 }
 0x198   :  { %v419_v22 = vpop.trf.xlu1  ;;  %1369 = vmatpush3.msra.mxu0 %v1788_v40 }
 0x199   :  { %1324 = vmatprep.mubr.msk.f32.mxu0 %vm335_vm1, %v419_v22  ;;  %1370 = vmatprep.subr.mxu0 %v1797_v45  ;;  %v664_v4 = vpop.permute.xlu0 %663 }
 0x19a   :  { %1371 = vmatpush3.msra.mxu0 %v1797_v45 }
 0x19b   :  { %1372 = vmatprep.subr.mxu0 %v1804_v46 }
 0x19c   :  { %v420_v23 = vpop.trf.xlu1  ;;  %1373 = vmatpush3.msra.mxu0 %v1804_v46 }
 0x19d   :  { %1325 = vmatmul.mubr.msk.f32.gmra.mxu0 %vm335_vm1, %v420_v23 }
 0x1a0   :  { %v421_v24 = vpop.trf.xlu1 }
 0x1a1   :  { %1327 = vmatprep.mubr.msk.f32.mxu0 %vm335_vm1, %v421_v24 }
 0x1a4   :  { %v422_v25 = vpop.trf.xlu1 }
 0x1a5   :  { %1328 = vmatmul.mubr.msk.f32.gmra.mxu0 %vm335_vm1, %v422_v25 }
 0x1c3   :  { %s1415_s12 = spop %1414 }
 0x1c4   :  { %v360_v29 = vstv %s1415_s12 }
 0x1c5   :  { %1427 = vrsqrt.f32 %v360_v29 }
 0x1d2   :  { %v1428_v41 = vpop.eup %1427 }
 0x1d3   :  { %1416 = vpush %v1428_v41 }
 0x1d4   :  { %1418 = vpush %v393_v43 }
 0x204   :  { %s1417_s4 = spop %1416 }
 0x205   :  { %s1419_s23 = spop %1418 }
 0x206   :  { %v395_v48 = vstv %s1419_s23 }
 0x207   :  { %1429 = vrsqrt.f32 %v395_v48 }
 0x214   :  { %v1430_v52 = vpop.eup %1429 }
 0x215   :  { %1420 = vpush %v1430_v52 }
 0x246   :  { %s1421_s6 = spop %1420 }
 0x247   :  { %s398_s24 = smul.f32 %s1421_s6, %s1417_s4 }
 0x249   :  { %s638_s25 = smul.f32 2.0, %s398_s24  ;;  %v600_v24 = vstv %s398_s24 }
 0x24a   :  { %v608_v26 = vmul.f32 %v600_v24, %v1751_v19  ;;  %v607_v29 = vmul.f32 %v600_v24, %v1756_v20  ;;  %v606_v32 = vmul.f32 %v600_v24, %v1763_v21  ;;  %v605_v43 = vmul.f32 %v600_v24, %v1776_v35 }
 0x24b   :  { %v639_v8 = vstv %s638_s25  ;;  %v604_v48 = vmul.f32 %v600_v24, %v1781_v36  ;;  %v603_v53 = vmul.f32 %v600_v24, %v1788_v40  ;;  %v602_v20 = vmul.f32 %v600_v24, %v1797_v45  ;;  %v963_v36 = vld [vmem:[%s1904_s7] sm:$0xff] }
 0x24c   :  { %v640_v37 = vmul.f32 %v639_v8, %v637_v44  ;;  %v601_v35 = vmul.f32 %v600_v24, %v1804_v46  ;;  %v666_v8 = vpop.permute.xlu0 %665 }
 0x24d   :  { %v1320_v10 = vpop.f32.mrf.mxu0 }
 0x24e   :  { %v810_v9 = vmul.f32 %v640_v37, %v1621_v34  ;;  %v811_v49 = vmul.f32 %v640_v37, %v1630_v39  ;;  %v812_v42 = vmul.f32 %v640_v37, %v1645_v47  ;;  %v813_v11 = vmul.f32 %v640_v37, %v1660_v54 }
 0x24f   :  { %v814_v12 = vmul.f32 %v640_v37, %v1672_v61  ;;  %v553_v34 = vpop.f32.mrf.mxu0  ;;  %v815_v14 = vmul.f32 %v640_v37, %v1682_v3  ;;  %v816_v15 = vmul.f32 %v640_v37, %v1693_v13  ;;  %v817_v17 = vmul.f32 %v640_v37, %v1700_v18 }
 0x250   :  { %1374 = vmatprep.mubr.msk.f32.mxu0 %vm335_vm1, %v810_v9  ;;  %v610_v55 = vmul.f32 %v1320_v10, %v602_v20  ;;  %v609_v56 = vmul.f32 %v601_v35, %v553_v34 }
 0x251   :  { %1375 = vmatmul.mubr.msk.f32.vlgmr.msra.gmra.mxu0 %vm335_vm1, %v811_v49 }
 0x252   :  { %1377 = vmatprep.mubr.msk.f32.mxu0 %vm335_vm1, %v812_v42 }
 0x255   :  { %1378 = vmatmul.mubr.msk.f32.gmra.mxu0 %vm335_vm1, %v813_v11  ;;  %v1323_v16 = vpop.f32.mrf.mxu0 }
 0x256   :  { %1380 = vmatprep.mubr.msk.f32.mxu0 %vm335_vm1, %v814_v12  ;;  %v612_v19 = vmul.f32 %v1323_v16, %v604_v48 }
 0x257   :  { %v563_v22 = vpop.f32.mrf.mxu0 }
 0x258   :  { %v611_v21 = vmul.f32 %v603_v53, %v563_v22  ;;  %v668_v22 = vpop.permute.xlu0 %667 }
 0x259   :  { %1381 = vmatmul.mubr.msk.f32.gmra.mxu0 %vm335_vm1, %v815_v14 }
 0x25a   :  { %1383 = vmatprep.mubr.msk.f32.mxu0 %vm335_vm1, %v816_v15 }
 0x25c   :  { %v670_v48 = vpop.permute.xlu0 %669 }
 0x25d   :  { %1384 = vmatmul.mubr.msk.f32.gmra.mxu0 %vm335_vm1, %v817_v17  ;;  %v1326_v23 = vpop.f32.mrf.mxu0 }
 0x25e   :  { %v614_v41 = vmul.f32 %v1326_v23, %v606_v32 }
 0x25f   :  { %v573_v25 = vpop.f32.mrf.mxu0 }
 0x260   :  { %v613_v52 = vmul.f32 %v605_v43, %v573_v25 }
 0x265   :  { %v1329_v27 = vpop.f32.mrf.mxu0 }
 0x266   :  { %v616_v28 = vmul.f32 %v1329_v27, %v608_v26 }
 0x267   :  { %v583_v31 = vpop.f32.mrf.mxu0 }
 0x268   :  { %v615_v38 = vmul.f32 %v607_v29, %v583_v31  ;;  %1330 = vmatprep.subr.mxu1 %v616_v28 }
 0x269   :  { %1331 = vmatpush3.msra.mxu1 %v616_v28 }
 0x26a   :  { %1332 = vmatprep.subr.mxu1 %v615_v38 }
 0x26b   :  { %1333 = vmatpush3.msra.mxu1 %v615_v38 }
 0x26c   :  { %1334 = vmatprep.subr.mxu1 %v614_v41 }
 0x26d   :  { %1335 = vmatpush3.msra.mxu1 %v614_v41  ;;  %v672_v41 = vpop.permute.xlu1 %671 }
 0x26e   :  { %1336 = vmatprep.subr.mxu1 %v613_v52 }
 0x26f   :  { %1337 = vmatpush3.msra.mxu1 %v613_v52 }
 0x270   :  { %1338 = vmatprep.subr.mxu1 %v612_v19 }
 0x271   :  { %1339 = vmatpush3.msra.mxu1 %v612_v19 }
 0x272   :  { %1340 = vmatprep.subr.mxu1 %v611_v21 }
 0x273   :  { %1341 = vmatpush3.msra.mxu1 %v611_v21 }
 0x274   :  { %1342 = vmatprep.subr.mxu1 %v610_v55 }
 0x275   :  { %1343 = vmatpush3.msra.mxu1 %v610_v55 }
 0x276   :  { %1344 = vmatprep.subr.mxu1 %v609_v56 }
 0x277   :  { %1345 = vmatpush3.msra.mxu1 %v609_v56 }
 0x278   :  { %1347 = vmatmul.mubr.msk.f32.vlgmr.msra.gmra.mxu1 %vm335_vm1, %v1630_v39  ;;  %v970_v39 = vld [vmem:[%s1904_s7 + $0x38] sm:$0xff] }
 0x279   :  { %1349 = vmatprep.mubr.msk.f32.mxu1 %vm335_vm1, %v1645_v47  ;;  %v969_v47 = vld [vmem:[%s1904_s7 + $0x30] sm:$0xff]  ;;  %1386 = vmatprep.subr.mxu1 %v970_v39 }
 0x27a   :  { %1387 = vmatpush3.msra.mxu1 %v970_v39 }
 0x27b   :  { %1388 = vmatprep.subr.mxu1 %v969_v47 }
 0x27c   :  { %1350 = vmatmul.mubr.msk.f32.gmra.mxu1 %vm335_vm1, %v1660_v54  ;;  %v968_v54 = vld [vmem:[%s1904_s7 + $0x28] sm:$0xff] }
 0x27d   :  { %1352 = vmatprep.mubr.msk.f32.mxu1 %vm335_vm1, %v1672_v61  ;;  %1389 = vmatpush3.msra.mxu1 %v969_v47  ;;  %v967_v61 = vld [vmem:[%s1904_s7 + $0x20] sm:$0xff] }
 0x27e   :  { %1390 = vmatprep.subr.mxu1 %v968_v54 }
 0x27f   :  { %1391 = vmatpush3.msra.mxu1 %v968_v54 }
 0x280   :  { %1353 = vmatmul.mubr.msk.f32.gmra.mxu1 %vm335_vm1, %v1682_v3  ;;  %1392 = vmatprep.subr.mxu1 %v967_v61  ;;  %v966_v3 = vld [vmem:[%s1904_s7 + $0x18] sm:$0xff] }
 0x281   :  { %1355 = vmatprep.mubr.msk.f32.mxu1 %vm335_vm1, %v1693_v13  ;;  %1393 = vmatpush3.msra.mxu1 %v967_v61  ;;  %v965_v13 = vld [vmem:[%s1904_s7 + $0x10] sm:$0xff] }
 0x282   :  { %1394 = vmatprep.subr.mxu1 %v966_v3 }
 0x283   :  { %1395 = vmatpush3.msra.mxu1 %v966_v3 }
 0x284   :  { %1356 = vmatmul.mubr.msk.f32.gmra.mxu1 %vm335_vm1, %v1700_v18  ;;  %1396 = vmatprep.subr.mxu1 %v965_v13  ;;  %v964_v18 = vld [vmem:[%s1904_s7 + $0x8] sm:$0xff]  ;;  %s1470_s7 = smov [#allocation2]  }
 0x285   :  { %1397 = vmatpush3.msra.mxu1 %v965_v13  ;;  %s1113_s15 = sshll.u32 %s1470_s7, 4  ;;  %s1114_s15 = int_to_ptr.vmem [resolvable:$true] %s1113_s15 }
 0x286   :  { %1398 = vmatprep.subr.mxu1 %v964_v18  ;;  %s1447_s16 = scalar_lea.vmem %s1114_s15, 1024  ;;  %p1452_p1 = scmp.lt.s32.totalorder %s1114_s15, %s1114_s15 }
 0x287   :  { %1399 = vmatpush3.msra.mxu1 %v964_v18  ;;  %p1448_p0 = scmp.ne.s32.totalorder %s1114_s15, %s1447_s16  ;;  %p1453_p2 = scmp.lt.s32.totalorder %s1447_s16, %s1447_s16 }
 0x288   :  { %1400 = vmatprep.subr.mxu1 %v963_v36 }
 0x289   :  { %1401 = vmatpush3.msra.mxu1 %v963_v36  ;;  %p1454_p3 = por %p1453_p2, %p1452_p1 }
 0x28b   :  { %p1455_p4 = pnand %p1454_p3, %p1448_p0 }
 0x311   :  { %v1376_v40 = vpop.f32.mrf.mxu0 }
 0x312   :  { %v914_v63 = vadd.f32 128.0, %v1376_v40 }
 0x313   :  { %v908_v45 = vpop.f32.mrf.mxu0 }
 0x314   :  { %v909_v62 = vadd.f32 128.0, %v908_v45 }
 0x315   :  { %v1379_v46 = vpop.f32.mrf.mxu0 }
 0x316   :  { %1431 = vrcp.f32 %v909_v62  ;;  %v924_v1 = vadd.f32 128.0, %v1379_v46 }
 0x317   :  { %v918_v58 = vpop.f32.mrf.mxu0  ;;  %1433 = vrcp.f32 %v914_v63 }
 0x318   :  { %v919_v50 = vadd.f32 128.0, %v918_v58 }
 0x319   :  { %v1382_v60 = vpop.f32.mrf.mxu0 }
 0x31a   :  { %1435 = vrcp.f32 %v919_v50  ;;  %v934_v5 = vadd.f32 128.0, %v1382_v60 }
 0x31b   :  { %v928_v0 = vpop.f32.mrf.mxu0  ;;  %1437 = vrcp.f32 %v924_v1 }
 0x31c   :  { %v929_v2 = vadd.f32 128.0, %v928_v0 }
 0x31d   :  { %v1385_v33 = vpop.f32.mrf.mxu0 }
 0x31e   :  { %1439 = vrcp.f32 %v929_v2  ;;  %v944_v7 = vadd.f32 128.0, %v1385_v33 }
 0x31f   :  { %v938_v30 = vpop.f32.mrf.mxu0  ;;  %1441 = vrcp.f32 %v934_v5 }
 0x320   :  { %v939_v6 = vadd.f32 128.0, %v938_v30 }
 0x322   :  { %1443 = vrcp.f32 %v939_v6 }
 0x323   :  { %v1432_v42 = vpop.eup %1431  ;;  %1445 = vrcp.f32 %v944_v7 }
 0x324   :  { %v1434_v11 = vpop.eup %1433 }
 0x327   :  { %v1436_v17 = vpop.eup %1435 }
 0x328   :  { %v1438_v24 = vpop.eup %1437 }
 0x32b   :  { %v1440_v31 = vpop.eup %1439 }
 0x32c   :  { %v1442_v38 = vpop.eup %1441 }
 0x32f   :  { %v1444_v21 = vpop.eup %1443 }
 0x330   :  { %v1446_v55 = vpop.eup %1445 }
 0x338   :  { %v1348_v44 = vpop.f32.mrf.mxu1 }
 0x339   :  { %v777_v37 = vadd.f32 %v1348_v44, %v660_v59 }
 0x33a   :  { %v771_v9 = vpop.f32.mrf.mxu1 }
 0x33b   :  { %v772_v49 = vadd.f32 %v771_v9, %v658_v57  ;;  %v956_v34 = vmul.f32 %v1434_v11, %v777_v37 }
 0x33c   :  { %v1351_v10 = vpop.f32.mrf.mxu1 }
 0x33d   :  { %v955_v12 = vmul.f32 %v1432_v42, %v772_v49  ;;  %v787_v14 = vadd.f32 %v1351_v10, %v664_v4 }
 0x33e   :  { %v781_v15 = vpop.f32.mrf.mxu1 }
 0x33f   :  { %v782_v16 = vadd.f32 %v781_v15, %v662_v51  ;;  %1402 = vmatprep.mubr.msk.f32.mxu1 %vm335_vm1, %v955_v12  ;;  %v958_v26 = vmul.f32 %v1438_v24, %v787_v14 }
 0x340   :  { %v1354_v23 = vpop.f32.mrf.mxu1  ;;  %1403 = vmatmul.mubr.msk.f32.vlgmr.msra.gmra.mxu1 %vm335_vm1, %v956_v34 }
 0x341   :  { %v957_v25 = vmul.f32 %v1436_v17, %v782_v16  ;;  %v797_v27 = vadd.f32 %v1354_v23, %v668_v22 }
 0x342   :  { %v791_v28 = vpop.f32.mrf.mxu1 }
 0x343   :  { %v792_v29 = vadd.f32 %v791_v28, %v666_v8  ;;  %1405 = vmatprep.mubr.msk.f32.mxu1 %vm335_vm1, %v957_v25  ;;  %v960_v52 = vmul.f32 %v1442_v38, %v797_v27 }
 0x344   :  { %v1357_v32 = vpop.f32.mrf.mxu1  ;;  %1406 = vmatmul.mubr.msk.f32.gmra.mxu1 %vm335_vm1, %v958_v26 }
 0x345   :  { %v959_v43 = vmul.f32 %v1440_v31, %v792_v29  ;;  %v807_v19 = vadd.f32 %v1357_v32, %v672_v41 }
 0x346   :  { %v801_v53 = vpop.f32.mrf.mxu1 }
 0x347   :  { %v802_v20 = vadd.f32 %v801_v53, %v670_v48  ;;  %1408 = vmatprep.mubr.msk.f32.mxu1 %vm335_vm1, %v959_v43  ;;  %v962_v56 = vmul.f32 %v1446_v55, %v807_v19 }
 0x348   :  { %1409 = vmatmul.mubr.msk.f32.gmra.mxu1 %vm335_vm1, %v960_v52 }
 0x349   :  { %v961_v35 = vmul.f32 %v1444_v21, %v802_v20 }
 0x34b   :  { %1411 = vmatprep.mubr.msk.f32.mxu1 %vm335_vm1, %v961_v35 }
 0x34c   :  { %1412 = vmatmul.mubr.msk.f32.gmra.mxu1 %vm335_vm1, %v962_v56 }
 0x400   :  { %v1404_v39 = vpop.f32.mrf.mxu1 }
 0x401   :  { %1101 = vst [vmem:[#allocation2 + $0x8] sm:$0xff] %v1404_v39 }
 0x402   :  { %v1061_v47 = vpop.f32.mrf.mxu1 }
 0x403   :  { %1100 = vst [vmem:[#allocation2] sm:$0xff] %v1061_v47 }
 0x404   :  { %v1407_v54 = vpop.f32.mrf.mxu1 }
 0x405   :  { %1103 = vst [vmem:[#allocation2 + $0x18] sm:$0xff] %v1407_v54 }
 0x406   :  { %v1071_v61 = vpop.f32.mrf.mxu1 }
 0x407   :  { %1102 = vst [vmem:[#allocation2 + $0x10] sm:$0xff] %v1071_v61 }
 0x408   :  { %v1410_v3 = vpop.f32.mrf.mxu1 }
 0x409   :  { %1105 = vst [vmem:[#allocation2 + $0x28] sm:$0xff] %v1410_v3 }
 0x40a   :  { %v1081_v13 = vpop.f32.mrf.mxu1 }
 0x40b   :  { %1104 = vst [vmem:[#allocation2 + $0x20] sm:$0xff] %v1081_v13 }
 0x40c   :  { %v1413_v18 = vpop.f32.mrf.mxu1 }
 0x40d   :  { %1107 = vst [vmem:[#allocation2 + $0x38] sm:$0xff] %v1413_v18 }
 0x40e   :  { %v1091_v36 = vpop.f32.mrf.mxu1 }
 0x40f   :  { %1106 = vst [vmem:[#allocation2 + $0x30] sm:$0xff] %v1091_v36 }
 0x410   :  { %1458 = shalt.err (!%p1455_p4)
}
 0x411   :  { %s1471_s17 = smov 128   ;;  %s1472_s18 = smov 8  }
 0x412   :  { %1119 = dma.vmem_to_hbm [thread:$0]  %s1114_s15, 1024, %s1905_s8, [#allocation3], %s1471_s17, %s1471_s17, %s1472_s18  }
 0x413   :  { %1467 = dma.done.wait [#allocation3], 1024  }
 0x414   :  { %1468 = vsyncadd [#allocation3], 4294966272 }
 0x415   :  { %1123 = vsyncpa [#allocation3], 1 }

</bundles_post_ra>
